<compile_context>
chip_gen: v7x
topology: tpu7x:2x2x1
jax: 0.10.0
libtpu: 0.0.40
codegen_flags: <defaults>
</compile_context>

<pallas_src>
import functools

import jax
import jax.numpy as jnp
from jax.experimental import pallas as pl
from jax.experimental.pallas import tpu as pltpu


def _round_up(x, m):
    return (x + m - 1) // m * m


def _moving_avg_kernel(x_ref, o_ref, buf_ref, *acc_scratch,
                       K, stride, pad, L, L_out, start, buf_len,
                       direct, wstop, q_blocks, rem):
    """x_ref: (L, TN); o_ref: (L_out, TN); buf_ref: (buf_len, TN) f32 scratch;
    acc_scratch: optional (L_out, TN) f32 accumulator (only when rem > 0)."""
    TN = x_ref.shape[-1]
    f32 = jnp.float32
    base = start - pad          # buffer row holding padded-sequence index 0
    inv_k = 1.0 / K

    # ---- Fused edge-replicated padding (VMEM only, never touches HBM) -----
    # Interior copy is sublane-aligned (start % 8 == 0); the pads fill the
    # whole buffer so every later read (incl. doubling tails) is defined.
    buf_ref[pl.ds(start, L), :] = x_ref[...].astype(f32)
    if start > 0:
        buf_ref[pl.ds(0, start), :] = jnp.broadcast_to(
            x_ref[pl.ds(0, 1), :].astype(f32), (start, TN))
    tail = buf_len - (start + L)
    if tail > 0:
        buf_ref[pl.ds(start + L, tail), :] = jnp.broadcast_to(
            x_ref[pl.ds(L - 1, 1), :].astype(f32), (tail, TN))

    def win(j):
        """(L_out, TN) read of the buffer at padded index j, stride-decimated."""
        if stride == 1:
            return buf_ref[pl.ds(base + j, L_out), :]
        return buf_ref[pl.ds(base + j, L_out, stride), :]

    if direct:
        # Small K: one fused expression, K shifted reads, single output store.
        total = win(0)
        for j in range(1, K):
            total = total + win(j)
        o_ref[...] = (total * inv_k).astype(o_ref.dtype)
        return

    # ---- Large K: hybrid block decomposition -------------------------------
    #   out[t] = sum_q W_wstop[t*stride + q*wstop]   (q = 0..Q-1)
    #          + sum_j xp[t*stride + j]              (j = Q*wstop .. K-1)
    # The remainder is read from the raw padded buffer *before* the in-place
    # doubling overwrites it, into an explicit f32 accumulator scratch.
    if rem > 0:
        acc_ref = acc_scratch[0]
        rsum = win(q_blocks * wstop)
        for j in range(q_blocks * wstop + 1, K):
            rsum = rsum + win(j)
        acc_ref[...] = rsum

    # In-place binary doubling: after the pass with shift w the buffer holds
    # W_{2w}[t] = sum_{j<2w} xp_buf[t+j] on rows [0, buf_len - 2w + 1).
    # Forward (increasing-row) shifted add: RHS is read before the store.
    w = 1
    while w < wstop:
        n = buf_len - 2 * w + 1
        buf_ref[pl.ds(0, n), :] = (buf_ref[pl.ds(0, n), :] +
                                   buf_ref[pl.ds(w, n), :])
        w *= 2

    total = win(0)
    for q in range(1, q_blocks):
        total = total + win(q * wstop)
    if rem > 0:
        total = total + acc_scratch[0][...]
    o_ref[...] = (total * inv_k).astype(o_ref.dtype)


def _vmem_capacity_bytes():
    try:
        return int(pltpu.get_tpu_info().vmem_capacity_bytes)
    except Exception:
        return 64 * 1024 * 1024     # conservative (v7x-class) fallback


def _choose_lane_tile(n_lanes, per_lane_bytes, budget_bytes, want_multi):
    """Lane-axis tile width: the full extent when it fits and this axis does
    not need >= 2 grid steps for pipelining, otherwise the largest multiple of
    128 under the per-block VMEM budget (capped near n_lanes/2 when >= 2 grid
    steps along this axis are wanted)."""
    if n_lanes <= 128:
        return n_lanes
    if not want_multi and n_lanes * per_lane_bytes <= budget_bytes:
        return n_lanes
    fit = max(128, (budget_bytes // max(per_lane_bytes, 1)) // 128 * 128)
    cap = _round_up((n_lanes + 1) // 2, 128) if want_multi else _round_up(n_lanes, 128)
    return max(128, min(fit, cap))


def moving_avg(x, kernel_size, stride=1):
    """Pallas equivalent of the PyTorch moving_avg.forward. x: [B, L, C] -> [B, L_out, C]."""
    B, L, C = x.shape
    K = int(kernel_size)
    stride = int(stride)
    pad = (K - 1) // 2
    L_pad = L + 2 * pad
    assert L_pad >= K, "kernel_size too large for sequence length"
    L_out = (L_pad - K) // stride + 1
    assert L_out >= 1

    # Sublane-aligned interior offset inside the f32 padded scratch buffer.
    start = _round_up(pad, 8)
    buf_len = _round_up(start + L + pad, 8)

    # Static window-sum plan.
    direct = K <= 16
    if direct:
        wstop, q_blocks, rem = 1, 0, 0
    else:
        wstop = 8
        while K // wstop > 8:
            wstop *= 2
        q_blocks, rem = K // wstop, K % wstop
    need_acc = (not direct) and rem > 0

    # Generation-aware per-block VMEM budget.
    itemsize = jnp.dtype(x.dtype).itemsize
    per_lane = (2 * L * itemsize           # double-buffered input block
                + 2 * L_out * itemsize     # double-buffered output block
                + buf_len * 4              # f32 padded window buffer
                + (L_out * 4 if need_acc else 0))
    vmem_cap = _vmem_capacity_bytes()
    small_vmem = vmem_cap <= 64 * 1024 * 1024           # v7x-class parts
    budget = (16 if small_vmem else 24) * 1024 * 1024
    limit_cap = (40 if small_vmem else 96) * 1024 * 1024

    kernel = functools.partial(
        _moving_avg_kernel, K=K, stride=stride, pad=pad, L=L, L_out=L_out,
        start=start, buf_len=buf_len, direct=direct, wstop=wstop,
        q_blocks=q_blocks, rem=rem)

    def _scratch(tile):
        s = [pltpu.VMEM((buf_len, tile), jnp.float32)]
        if need_acc:
            s.append(pltpu.VMEM((L_out, tile), jnp.float32))
        return s

    def _vmem_limit(tile):
        est = per_lane * tile + (1 << 20)
        if est <= 10 * 1024 * 1024:
            return None
        return int(min(max(2 * est, 32 * 1024 * 1024), limit_cap))

    if C >= 128:
        # ---- Main path: no layout round-trips; channels are the lane axis. -
        tc = _choose_lane_tile(C, per_lane, budget, want_multi=(B < 2))
        grid = (B, pl.cdiv(C, tc))
        return pl.pallas_call(
            kernel,
            out_shape=jax.ShapeDtypeStruct((B, L_out, C), x.dtype),
            grid=grid,
            in_specs=[pl.BlockSpec((None, L, tc), lambda b, c: (b, 0, c))],
            out_specs=pl.BlockSpec((None, L_out, tc), lambda b, c: (b, 0, c)),
            scratch_shapes=_scratch(tc),
            compiler_params=pltpu.CompilerParams(
                dimension_semantics=("parallel", "parallel"),
                vmem_limit_bytes=_vmem_limit(tc)),
        )(x)

    # ---- Fallback for small C: lane-dense (L, B*C) layout (transposes). ----
    # TODO(synk): when the grid collapses to a single step (tiny B*C), add a
    # time-axis grid with halo DMA so the pipeline still overlaps and both
    # v7x TensorCores get work.
    N = B * C
    xt = jnp.transpose(x, (1, 0, 2)).reshape(L, N)
    tn = _choose_lane_tile(N, per_lane, budget, want_multi=True)
    grid = (pl.cdiv(N, tn),)
    out_t = pl.pallas_call(
        kernel,
        out_shape=jax.ShapeDtypeStruct((L_out, N), x.dtype),
        grid=grid,
        in_specs=[pl.BlockSpec((L, tn), lambda n: (0, n))],
        out_specs=pl.BlockSpec((L_out, tn), lambda n: (0, n)),
        scratch_shapes=_scratch(tn),
        compiler_params=pltpu.CompilerParams(
            dimension_semantics=("parallel",),
            vmem_limit_bytes=_vmem_limit(tn)),
    )(xt)
    return jnp.transpose(out_t.reshape(L_out, B, C), (1, 0, 2))


def _reference_moving_avg(x, kernel_size, stride):
    """Pure-JAX reference mirroring the PyTorch semantics."""
    pad = (kernel_size - 1) // 2
    front = jnp.repeat(x[:, 0:1, :], pad, axis=1)
    end = jnp.repeat(x[:, -1:, :], pad, axis=1)
    xp = jnp.concatenate([front, x, end], axis=1)
    L_pad = xp.shape[1]
    L_out = (L_pad - kernel_size) // stride + 1
    windows = jnp.stack(
        [xp[:, t * stride: t * stride + kernel_size, :] for t in range(L_out)],
        axis=1)  # [B, L_out, K, C]
    return jnp.mean(windows, axis=2)


if __name__ == "__main__":
    configs = [
        # (B, L, C, kernel_size, stride)
        (2, 32, 128, 25, 1),   # main path (C >= 128, no transposes), hybrid sums
        (2, 32, 128, 25, 2),   # main path, stride > 1 (strided window reads)
        (1, 40, 256, 33, 1),   # main path, B=1 -> lane axis split into 2 tiles
        (2, 16, 8, 4, 1),      # small-C fallback, even K, direct sums
        (4, 24, 48, 7, 1),     # small-C fallback, B*C=192 -> 2 lane tiles
    ]
    for i, (B, L, C, K, S) in enumerate(configs):
        key = jax.random.fold_in(jax.random.PRNGKey(0), i)
        x = jax.random.normal(key, (B, L, C), dtype=jnp.float32)

        out = jax.block_until_ready(moving_avg(x, K, S))
        ref = _reference_moving_avg(x, K, S)

        assert out.shape == ref.shape, (i, out.shape, ref.shape)
        max_err = float(jnp.max(jnp.abs(out - ref)))
        assert jnp.allclose(out, ref, atol=1e-4, rtol=1e-4), (
            f"mismatch in config {i}: max abs err {max_err}")

    print("KERNEL_OK")
</pallas_src>

<mosaic_0001>
module attributes {stable_mosaic.version = 11 : i64} {
  func.func @_moving_avg_kernel(%arg0: i32, %arg1: i32, %arg2: memref<1x32x128xf32, #tpu.memory_space<vmem>>, %arg3: memref<1x32x128xf32, #tpu.memory_space<vmem>>, %arg4: memref<64x128xf32, #tpu.memory_space<vmem>>, %arg5: memref<32x128xf32, #tpu.memory_space<vmem>>) attributes {dimension_semantics = [#tpu.dimension_semantics<parallel>, #tpu.dimension_semantics<parallel>], iteration_bounds = array<i64: 2, 1>, scalar_prefetch = 0 : i64, scratch_operands = 2 : i64, tpu.core_type = #tpu.core_type<tc>, window_params = [{transform_indices = @transform_0, window_bounds = array<i64: 1, 32, 128>}, {transform_indices = @transform_1, window_bounds = array<i64: 1, 32, 128>}]} {
    %c0 = arith.constant 0 : index
    %c0_0 = arith.constant 0 : index
    %c0_1 = arith.constant 0 : index
    %0 = vector.load %arg2[%c0, %c0_0, %c0_1] : memref<1x32x128xf32, #tpu.memory_space<vmem>>, vector<1x32x128xf32>
    %1 = vector.shape_cast %0 : vector<1x32x128xf32> to vector<32x128xf32>
    %c16 = arith.constant 16 : index
    %c0_2 = arith.constant 0 : index
    %2 = vector.load %arg4[%c16, %c0_2] : memref<64x128xf32, #tpu.memory_space<vmem>>, vector<32x128xf32>
    tpu.vector_store %arg4[%c16, %c0_2], %1 {strides = array<i32>} : memref<64x128xf32, #tpu.memory_space<vmem>>, vector<32x128xf32>,
    %c0_3 = arith.constant 0 : index
    %c0_4 = arith.constant 0 : index
    %c0_5 = arith.constant 0 : index
    %3 = vector.load %arg2[%c0_3, %c0_4, %c0_5] : memref<1x32x128xf32, #tpu.memory_space<vmem>>, vector<1x1x128xf32>
    %4 = vector.shape_cast %3 : vector<1x1x128xf32> to vector<1x128xf32>
    %5 = vector.shape_cast %4 : vector<1x128xf32> to vector<1x128xf32>
    %6 = vector.broadcast %5 : vector<1x128xf32> to vector<16x128xf32>
    %c0_6 = arith.constant 0 : index
    %c0_7 = arith.constant 0 : index
    %7 = vector.load %arg4[%c0_6, %c0_7] : memref<64x128xf32, #tpu.memory_space<vmem>>, vector<16x128xf32>
    tpu.vector_store %arg4[%c0_6, %c0_7], %6 {strides = array<i32>} : memref<64x128xf32, #tpu.memory_space<vmem>>, vector<16x128xf32>,
    %c0_8 = arith.constant 0 : index
    %c31 = arith.constant 31 : index
    %c0_9 = arith.constant 0 : index
    %8 = vector.load %arg2[%c0_8, %c31, %c0_9] : memref<1x32x128xf32, #tpu.memory_space<vmem>>, vector<1x1x128xf32>
    %9 = vector.shape_cast %8 : vector<1x1x128xf32> to vector<1x128xf32>
    %10 = vector.shape_cast %9 : vector<1x128xf32> to vector<1x128xf32>
    %11 = vector.broadcast %10 : vector<1x128xf32> to vector<16x128xf32>
    %c48 = arith.constant 48 : index
    %c0_10 = arith.constant 0 : index
    %12 = vector.load %arg4[%c48, %c0_10] : memref<64x128xf32, #tpu.memory_space<vmem>>, vector<16x128xf32>
    tpu.vector_store %arg4[%c48, %c0_10], %11 {strides = array<i32>} : memref<64x128xf32, #tpu.memory_space<vmem>>, vector<16x128xf32>,
    %c28 = arith.constant 28 : index
    %c0_11 = arith.constant 0 : index
    %13 = vector.load %arg4[%c28, %c0_11] : memref<64x128xf32, #tpu.memory_space<vmem>>, vector<32x128xf32>
    %c0_12 = arith.constant 0 : index
    %c0_13 = arith.constant 0 : index
    %14 = vector.load %arg5[%c0_12, %c0_13] : memref<32x128xf32, #tpu.memory_space<vmem>>, vector<32x128xf32>
    tpu.vector_store %arg5[%c0_12, %c0_13], %13 {strides = array<i32>} : memref<32x128xf32, #tpu.memory_space<vmem>>, vector<32x128xf32>,
    %c0_14 = arith.constant 0 : index
    %c0_15 = arith.constant 0 : index
    %15 = vector.load %arg4[%c0_14, %c0_15] : memref<64x128xf32, #tpu.memory_space<vmem>>, vector<63x128xf32>
    %c1 = arith.constant 1 : index
    %c0_16 = arith.constant 0 : index
    %16 = vector.load %arg4[%c1, %c0_16] : memref<64x128xf32, #tpu.memory_space<vmem>>, vector<63x128xf32>
    %17 = arith.addf %15, %16 : vector<63x128xf32>
    %c0_17 = arith.constant 0 : index
    %c0_18 = arith.constant 0 : index
    %18 = vector.load %arg4[%c0_17, %c0_18] : memref<64x128xf32, #tpu.memory_space<vmem>>, vector<63x128xf32>
    tpu.vector_store %arg4[%c0_17, %c0_18], %17 {strides = array<i32>} : memref<64x128xf32, #tpu.memory_space<vmem>>, vector<63x128xf32>,
    %c0_19 = arith.constant 0 : index
    %c0_20 = arith.constant 0 : index
    %19 = vector.load %arg4[%c0_19, %c0_20] : memref<64x128xf32, #tpu.memory_space<vmem>>, vector<61x128xf32>
    %c2 = arith.constant 2 : index
    %c0_21 = arith.constant 0 : index
    %20 = vector.load %arg4[%c2, %c0_21] : memref<64x128xf32, #tpu.memory_space<vmem>>, vector<61x128xf32>
    %21 = arith.addf %19, %20 : vector<61x128xf32>
    %c0_22 = arith.constant 0 : index
    %c0_23 = arith.constant 0 : index
    %22 = vector.load %arg4[%c0_22, %c0_23] : memref<64x128xf32, #tpu.memory_space<vmem>>, vector<61x128xf32>
    tpu.vector_store %arg4[%c0_22, %c0_23], %21 {strides = array<i32>} : memref<64x128xf32, #tpu.memory_space<vmem>>, vector<61x128xf32>,
    %c0_24 = arith.constant 0 : index
    %c0_25 = arith.constant 0 : index
    %23 = vector.load %arg4[%c0_24, %c0_25] : memref<64x128xf32, #tpu.memory_space<vmem>>, vector<57x128xf32>
    %c4 = arith.constant 4 : index
    %c0_26 = arith.constant 0 : index
    %24 = vector.load %arg4[%c4, %c0_26] : memref<64x128xf32, #tpu.memory_space<vmem>>, vector<57x128xf32>
    %25 = arith.addf %23, %24 : vector<57x128xf32>
    %c0_27 = arith.constant 0 : index
    %c0_28 = arith.constant 0 : index
    %26 = vector.load %arg4[%c0_27, %c0_28] : memref<64x128xf32, #tpu.memory_space<vmem>>, vector<57x128xf32>
    tpu.vector_store %arg4[%c0_27, %c0_28], %25 {strides = array<i32>} : memref<64x128xf32, #tpu.memory_space<vmem>>, vector<57x128xf32>,
    %c4_29 = arith.constant 4 : index
    %c0_30 = arith.constant 0 : index
    %27 = vector.load %arg4[%c4_29, %c0_30] : memref<64x128xf32, #tpu.memory_space<vmem>>, vector<32x128xf32>
    %c12 = arith.constant 12 : index
    %c0_31 = arith.constant 0 : index
    %28 = vector.load %arg4[%c12, %c0_31] : memref<64x128xf32, #tpu.memory_space<vmem>>, vector<32x128xf32>
    %29 = arith.addf %27, %28 : vector<32x128xf32>
    %c20 = arith.constant 20 : index
    %c0_32 = arith.constant 0 : index
    %30 = vector.load %arg4[%c20, %c0_32] : memref<64x128xf32, #tpu.memory_space<vmem>>, vector<32x128xf32>
    %31 = arith.addf %29, %30 : vector<32x128xf32>
    %c0_33 = arith.constant 0 : index
    %c0_34 = arith.constant 0 : index
    %32 = vector.load %arg5[%c0_33, %c0_34] : memref<32x128xf32, #tpu.memory_space<vmem>>, vector<32x128xf32>
    %33 = arith.addf %31, %32 : vector<32x128xf32>
    %cst = arith.constant 4.000000e-02 : f32
    %34 = vector.broadcast %cst : f32 to vector<32x128xf32>
    %35 = arith.mulf %33, %34 : vector<32x128xf32>
    %c0_35 = arith.constant 0 : index
    %c0_36 = arith.constant 0 : index
    %c0_37 = arith.constant 0 : index
    %36 = vector.load %arg3[%c0_35, %c0_36, %c0_37] : memref<1x32x128xf32, #tpu.memory_space<vmem>>, vector<1x32x128xf32>
    %37 = vector.shape_cast %36 : vector<1x32x128xf32> to vector<32x128xf32>
    %38 = vector.shape_cast %35 : vector<32x128xf32> to vector<1x32x128xf32>
    tpu.vector_store %arg3[%c0_35, %c0_36, %c0_37], %38 {strides = array<i32>} : memref<1x32x128xf32, #tpu.memory_space<vmem>>, vector<1x32x128xf32>,
    return
  }
  func.func @transform_0(%arg0: i32, %arg1: i32) -> (i32, i32, i32) {
    %c0_i32 = arith.constant 0 : i32
    %c0_i32_0 = arith.constant 0 : i32
    return %arg0, %c0_i32, %arg1 : i32, i32, i32
  }
  func.func @transform_1(%arg0: i32, %arg1: i32) -> (i32, i32, i32) {
    %c0_i32 = arith.constant 0 : i32
    %c0_i32_0 = arith.constant 0 : i32
    return %arg0, %c0_i32, %arg1 : i32, i32, i32
  }
}

</mosaic_0001>

<bundles_post_ra>
// kernel: tpu_custom_call.1
= control target key start
LH: loop header
LB: loop body
LE: loop exit
PB: predicated region body
PF: predicated region fallthrough
CT: control target
= control target key end

     0   :  { %6 = vsyncpa [#allocation5], 0  ;;  %s814_s0 = inlined_call_operand.hbm [shape: f32[2,32,128], index: 0, kind: input, shape index: {}]   ;;  %s815_s1 = inlined_call_operand.hbm [shape: f32[2,32,128], index: 1, kind: output, shape index: {}]  }
   0x1   :  { %8 = vsyncpa [#allocation5 + $0x1], 0 }
   0x2   :  { %9 = vsyncpa [#allocation6], 0 }
   0x3   :  { %11 = vsyncpa [#allocation6 + $0x1], 0  ;;  %s623_s6 = smov 0   ;;  %s625_s7 = smov 0  }
   0x4   :  { %s627_s8 = smov 0   ;;  %s629_s9 = smov 0  }
   0x5   :  { %s631_s10 = smov 0   ;;  %s633_s11 = smov 0  }
   0x6 LB: > { %s408_s12 = sadd.s32 4294967295, %s605_s11   ;;  %s409_s13 = sadd.s32 4294967294, %s605_s11   ;;  %s605_s11 = sphi %s633_s11, %s17_s11   ;;  %s601_s10 = sphi %s631_s10, %s830_s10   ;;  %s597_s9 = sphi %s629_s9, %s829_s9   ;;  %s593_s8 = sphi %s627_s8, %s828_s8   ;;  %s589_s7 = sphi %s625_s7, %s827_s7   ;;  %s585_s6 = sphi %s623_s6, %s826_s6  }
   0x7   : > { %s29_s14 = sadd.s32 1, %s601_s10  ;;  %s38_s15 = sadd.s32 1, %s593_s8 }
   0x8   : > { %p31_p0 = scmp.ge.s32.totalorder %s29_s14, 2  ;;  %p45_p1 = scmp.ne.s32.totalorder %s593_s8, %s589_s7 }
   0x9   : > { %p46_p2 = scmp.eq.s32.totalorder %s605_s11, 0  ;;  %p51_p3 = scmp.ne.s32.totalorder %s589_s7, %s585_s6 }
   0xa   : > { %s832_s14 = smov (%p31_p0, %s29_s14), 0  ;;  %p52_p5 = scmp.eq.s32.totalorder %s408_s12, 0 }
   0xb   : > { %p664_p4 = por %p46_p2, %p45_p1  ;;  %s33_s17 = ssub.s32 %s601_s10, %s832_s14 }
   0xc   : > { %p77_p6 = scmp.eq.s32.totalorder %s408_s12, 1  ;;  %p36_p7 = scmp.eq.s32.totalorder %s33_s17, 0 }
   0xd   : > { %p670_p8 = por %p52_p5, %p51_p3  ;;  %p83_p10 = scmp.eq.s32.totalorder %s409_s13, 1 }
   0xe   : > { %p674_p9 = por %p77_p6, %p45_p1  ;;  %p439_p13 = scmp.lt.s32.totalorder %s605_s11, 2 }
   0xf   : > { %s679_s20 = scalar_select %p36_p7, %s593_s8, %s38_s15  }
  0x10   : > { %s819_s19 = scalar_select %p674_p9, 1, 0 }
  0x11   : > { %p681_p11 = por %p83_p10, %p51_p3  ;;  %s103_s22 = sand.u32 1, %s593_s8  }
  0x12   : > { %s412_s23 = sshll.u32 %s103_s22, 5  ;;  %s425_s24 = sshll.u32 %s601_s10, 9 }
  0x13   : > { %s820_s21 = scalar_select %p681_p11, 1, 0 }
  0x14   : > { %s692_s27 = scalar_lea.hbm %s814_s0, %s425_s24  ;;  %s107_s28 = scalar_lea.vmem [#allocation4], %s412_s23 }
  0x15   : > { %s115_s29 = sshll.u32 %s107_s28, 4  ;;  %p698_p0 = pnand %p439_p13, %p664_p4  ;;  %s694_s29 = int_to_ptr.vmem [resolvable:$true] %s115_s29 }
  0x16   : > { %s703_s2 = scalar_lea.sflag [#allocation5], %s103_s22  ;;  %s493_s3 = scalar_lea.hbm %s692_s27, 512 }
  0x17   : > { %p494_p2 = scmp.ne.s32.totalorder %s692_s27, %s493_s3  ;;  %p495_p3 = pneg %p698_p0 }
  0x18   : > { %s498_s12 = scalar_lea.hbm %s814_s0, 1024  ;;  %p499_p4 = scmp.lt.u32.totalorder %s692_s27, %s814_s0 }
  0x19   : > { %p496_p5 = pnand %p495_p3, %p494_p2  ;;  %p500_p7 = scmp.lt.u32.totalorder %s498_s12, %s493_s3 }
  0x1a   : > { %p502_p13 = scmp.lt.u32.totalorder %s493_s3, %s692_s27 }
  0x1b   : > { %p497_p6 = pneg %p496_p5  ;;  %p501_p10 = por %p500_p7, %p499_p4 }
  0x1d   : > { %p503_p12 = por %p502_p13, %p501_p10 }
  0x1f   : > { %p504_p1 = pnand %p503_p12, %p497_p6 }
  0x21   : > { %507 = shalt.err (!%p504_p1)
}
  0x22   : > { %s508_s16 = scalar_lea.vmem %s694_s29, 512  ;;  %s607_s17 = smov [#allocation4]  }
  0x23   : > { %p509_p2 = scmp.ne.s32.totalorder %s694_s29, %s508_s16  ;;  %s513_s22 = sshll.u32 %s607_s17, 4  ;;  %s514_s22 = int_to_ptr.vmem [resolvable:$false] %s513_s22 }
  0x24   : > { %s515_s23 = scalar_lea.vmem %s514_s22, 1024  ;;  %p516_p9 = scmp.lt.s32.totalorder %s694_s29, %s514_s22 }
  0x25   : > { %p511_p5 = pnand %p509_p2, %p495_p3  ;;  %p517_p4 = scmp.lt.s32.totalorder %s515_s23, %s508_s16 }
  0x27   : > { %p512_p11 = pneg %p511_p5  ;;  %p518_p7 = por %p517_p4, %p516_p9 }
  0x29   : > { %p519_p10 = pnand %p518_p7, %p512_p11 }
  0x2b   : > { %522 = shalt.err (!%p519_p10)
}
  0x2c   : > { %s608_s24 = smov 128   ;;  %s609_s25 = smov 8  }
  0x2d   : > { %434 = dma.hbm_to_vmem [thread:$0]  (!%p698_p0), %s692_s27, 512, %s694_s29, %s703_s2, %s608_s24, %s608_s24, %s609_s25  }
  0x2e   : > { %p123_p12 = scmp.lt.s32.totalorder %s605_s11, 3  ;;  %p822_p1 = scmp.ge.s32.totalorder %s605_s11, 1 }
  0x30   : > { %p124_p3 = pnand %p822_p1, %p123_p12 }
  0x31   : > { %s735_s26 = sand.u32 (!%p124_p3), 1, %s589_s7  }
  0x32   : > { %127 = sbr.rel (%p124_p3) target bundleno = 125 (0x7d), region = 24  ;;  %s416_s28 = sshll.u32 (!%p124_p3), %s735_s26, 5 }
  0x33   : > { %s130_s3 = scalar_lea.sflag (!%p124_p3), [#allocation5], %s735_s26  ;;  %s133_s4 = scalar_lea.vmem (!%p124_p3), [#allocation4], %s416_s28 }
  0x39   : > { %576 = dma.done.wait (%p670_p8), %s130_s3, 512  }
  0x3a   : > { %578 = vsyncadd (%p670_p8), %s130_s3, 4294966784  ;;  %v152_v0 = vld [vmem:[%s133_s4] sm:$0xff]  ;;  %v153_v1 = vld [vmem:[%s133_s4 + $0x8] sm:$0xff]  ;;  %s151_s18 = scalar_lea.vmem [#allocation7], %s416_s28  ;;  %s426_s29 = sshll.u32 %s597_s9, 9 }
  0x3b   : > { %v154_v2 = vld [vmem:[%s133_s4 + $0x10] sm:$0xff]  ;;  %156 = vst [vmem:[#allocation2 + $0x10] sm:$0xff] %v152_v0  ;;  %157 = vst [vmem:[#allocation2 + $0x18] sm:$0xff] %v153_v1  ;;  %v155_v3 = vld [vmem:[%s133_s4 + $0x18] sm:$0xff]  ;;  %s323_s27 = sshll.u32 %s151_s18, 4  ;;  %s765_s5 = scalar_lea.hbm %s815_s1, %s426_s29  ;;  %s760_s27 = int_to_ptr.vmem [resolvable:$true] %s323_s27 }
  0x3c   : > { %158 = vst [vmem:[#allocation2 + $0x20] sm:$0xff] %v154_v2  ;;  %v418_v4 = vld [vmem:[%s133_s4] ss:$0 sm:$0xff]  ;;  %v419_v5 = vld [vmem:[%s133_s4 + $0x1f] ss:$0 sm:$0xff]  ;;  %159 = vst [vmem:[#allocation2 + $0x28] sm:$0xff] %v155_v3 }
  0x3d   : > { %165 = vst [vmem:[#allocation2] sm:$0xff] %v418_v4  ;;  %166 = vst [vmem:[#allocation2 + $0x8] sm:$0xff] %v418_v4  ;;  %s309_s9 = scalar_lea.sflag [#allocation6], %s735_s26  ;;  %s523_s12 = scalar_lea.vmem %s760_s27, 512 }
  0x3e   : > { %172 = vst [vmem:[#allocation2 + $0x30] sm:$0xff] %v419_v5  ;;  %173 = vst [vmem:[#allocation2 + $0x38] sm:$0xff] %v419_v5  ;;  %p524_p8 = scmp.ne.s32.totalorder %s760_s27, %s523_s12  ;;  %p823_p9 = scmp.ne.s32.totalorder %s819_s19, 0 }
  0x3f   : > { %s610_s13 = smov [#allocation7]  }
  0x40   : > { %p525_p11 = pnand %p524_p8, %p823_p9  ;;  %s527_s15 = sshll.u32 %s610_s13, 4  ;;  %s528_s15 = int_to_ptr.vmem [resolvable:$false] %s527_s15 }
  0x41   : > { %s529_s16 = scalar_lea.vmem %s528_s15, 1024  ;;  %p530_p6 = scmp.lt.s32.totalorder %s760_s27, %s528_s15 }
  0x42   : > { %v192_v6 = vld [vmem:[#allocation2 + $0x11] sm:$0xff]  ;;  %p526_p0 = pneg %p525_p11  ;;  %p531_p13 = scmp.lt.s32.totalorder %s529_s16, %s523_s12 }
  0x43   : > { %v193_v7 = vld [vmem:[#allocation2 + $0x19] sm:$0xff]  ;;  %v200_v10 = vadd.f32 %v192_v6, %v152_v0  ;;  %v194_v15 = vld [vmem:[#allocation2 + $0x21] sm:$0xff] }
  0x44   : > { %v190_v8 = vld [vmem:[#allocation2 + $0x1] sm:$0xff]  ;;  %v191_v9 = vld [vmem:[#allocation2 + $0x9] sm:$0xff]  ;;  %v201_v11 = vadd.f32 %v193_v7, %v153_v1  ;;  %v202_v17 = vadd.f32 %v194_v15, %v154_v2  ;;  %p532_p2 = por %p531_p13, %p530_p6 }
  0x45   : > { %v198_v12 = vadd.f32 %v418_v4, %v190_v8  ;;  %v199_v13 = vadd.f32 %v418_v4, %v191_v9  ;;  %v745_v14 = vld [vmem:[#allocation2 + $0x1c] sm:$0xff]  ;;  %v195_v16 = vld [vmem:[#allocation2 + $0x29] sm:$0xff]  ;;  %208 = vst [vmem:[#allocation2 + $0x10] sm:$0xff] %v200_v10  ;;  %v196_v19 = vld [vmem:[#allocation2 + $0x31] sm:$0xff] }
  0x46   : > { %209 = vst [vmem:[#allocation2 + $0x18] sm:$0xff] %v201_v11  ;;  %v203_v18 = vadd.f32 %v195_v16, %v155_v3  ;;  %v189_v20 = vld [vmem:[#allocation2 + $0x38] sm:$0x7f]  ;;  %v747_v21 = vld [vmem:[#allocation2 + $0x24] sm:$0xff]  ;;  %v749_v22 = vld [vmem:[#allocation2 + $0x2c] sm:$0xff]  ;;  %v204_v23 = vadd.f32 %v419_v5, %v196_v19  ;;  %p533_p5 = pnand %p532_p2, %p526_p0 }
  0x47   : > { %206 = vst [vmem:[#allocation2] sm:$0xff] %v198_v12  ;;  %207 = vst [vmem:[#allocation2 + $0x8] sm:$0xff] %v199_v13  ;;  %v197_v24 = vld [vmem:[#allocation2 + $0x39] sm:$0x7f] }
  0x48   : > { %210 = vst [vmem:[#allocation2 + $0x20] sm:$0xff] %v202_v17  ;;  %211 = vst [vmem:[#allocation2 + $0x28] sm:$0xff] %v203_v18  ;;  %v751_v25 = vld [vmem:[#allocation2 + $0x34] sm:$0xff]  ;;  %v205_v26 = vadd.f32 %v197_v24, %v189_v20 }
  0x49   : > { %212 = vst [vmem:[#allocation2 + $0x30] sm:$0xff] %v204_v23 }
  0x4a   : > { %213 = vst [vmem:[#allocation2 + $0x38] sm:$0x7f] %v205_v26 }
  0x4d   : > { %v224_v27 = vld [vmem:[#allocation2 + $0x12] sm:$0xff] }
  0x4e   : > { %v222_v28 = vld [vmem:[#allocation2 + $0x2] sm:$0xff]  ;;  %v223_v29 = vld [vmem:[#allocation2 + $0xa] sm:$0xff]  ;;  %v232_v30 = vadd.f32 %v224_v27, %v200_v10 }
  0x4f   : > { %v230_v31 = vadd.f32 %v222_v28, %v198_v12  ;;  %v231_v32 = vadd.f32 %v223_v29, %v199_v13  ;;  %v225_v33 = vld [vmem:[#allocation2 + $0x1a] sm:$0xff]  ;;  %v226_v34 = vld [vmem:[#allocation2 + $0x22] sm:$0xff] }
  0x50   : > { %240 = vst [vmem:[#allocation2 + $0x10] sm:$0xff] %v232_v30  ;;  %v233_v35 = vadd.f32 %v225_v33, %v201_v11  ;;  %v234_v36 = vadd.f32 %v226_v34, %v202_v17  ;;  %v227_v37 = vld [vmem:[#allocation2 + $0x2a] sm:$0xff] }
  0x51   : > { %238 = vst [vmem:[#allocation2] sm:$0xff] %v230_v31  ;;  %239 = vst [vmem:[#allocation2 + $0x8] sm:$0xff] %v231_v32  ;;  %v235_v38 = vadd.f32 %v227_v37, %v203_v18  ;;  %v228_v39 = vld [vmem:[#allocation2 + $0x32] sm:$0xff]  ;;  %v229_v41 = vld [vmem:[#allocation2 + $0x3a] sm:$0x1f] }
  0x52   : > { %v221_v40 = vld [vmem:[#allocation2 + $0x38] sm:$0x1f]  ;;  %241 = vst [vmem:[#allocation2 + $0x18] sm:$0xff] %v233_v35  ;;  %242 = vst [vmem:[#allocation2 + $0x20] sm:$0xff] %v234_v36  ;;  %v236_v42 = vadd.f32 %v228_v39, %v204_v23 }
  0x53   : > { %v237_v43 = vadd.f32 %v229_v41, %v221_v40  ;;  %243 = vst [vmem:[#allocation2 + $0x28] sm:$0xff] %v235_v38 }
  0x54   : > { %244 = vst [vmem:[#allocation2 + $0x30] sm:$0xff] %v236_v42 }
  0x55   : > { %245 = vst [vmem:[#allocation2 + $0x38] sm:$0x1f] %v237_v43 }
  0x58   : > { %v254_v44 = vld [vmem:[#allocation2 + $0x4] sm:$0xff]  ;;  %v255_v45 = vld [vmem:[#allocation2 + $0xc] sm:$0xff] }
  0x59   : > { %v262_v46 = vadd.f32 %v254_v44, %v230_v31  ;;  %v263_v47 = vadd.f32 %v255_v45, %v231_v32  ;;  %v256_v48 = vld [vmem:[#allocation2 + $0x14] sm:$0xff]  ;;  %v257_v49 = vld [vmem:[#allocation2 + $0x1c] sm:$0xff] }
  0x5a   : > { %v258_v50 = vld [vmem:[#allocation2 + $0x24] sm:$0xff]  ;;  %v264_v51 = vadd.f32 %v256_v48, %v232_v30  ;;  %v265_v52 = vadd.f32 %v257_v49, %v233_v35 }
  0x5b   : > { %v266_v53 = vadd.f32 %v258_v50, %v234_v36  ;;  %v259_v54 = vld [vmem:[#allocation2 + $0x2c] sm:$0xff]  ;;  %270 = vst [vmem:[#allocation2] sm:$0xff] %v262_v46  ;;  %271 = vst [vmem:[#allocation2 + $0x8] sm:$0xff] %v263_v47 }
  0x5c   : > { %v260_v55 = vld [vmem:[#allocation2 + $0x34] sm:$0xff]  ;;  %v267_v57 = vadd.f32 %v259_v54, %v235_v38  ;;  %272 = vst [vmem:[#allocation2 + $0x10] sm:$0xff] %v264_v51  ;;  %273 = vst [vmem:[#allocation2 + $0x18] sm:$0xff] %v265_v52  ;;  %v261_v59 = vld [vmem:[#allocation2 + $0x3c] sm:$0x1] }
  0x5d   : > { %v253_v56 = vld [vmem:[#allocation2 + $0x38] sm:$0x1]  ;;  %v268_v58 = vadd.f32 %v260_v55, %v236_v42  ;;  %274 = vst [vmem:[#allocation2 + $0x20] sm:$0xff] %v266_v53 }
  0x5e   : > { %v269_v60 = vadd.f32 %v261_v59, %v253_v56  ;;  %275 = vst [vmem:[#allocation2 + $0x28] sm:$0xff] %v267_v57 }
  0x5f   : > { %276 = vst [vmem:[#allocation2 + $0x30] sm:$0xff] %v268_v58 }
  0x60   : > { %277 = vst [vmem:[#allocation2 + $0x38] sm:$0x1] %v269_v60 }
  0x62   : > { %v278_v61 = vld [vmem:[#allocation2 + $0x4] sm:$0xff] }
  0x63   : > { %v279_v62 = vld [vmem:[#allocation2 + $0xc] sm:$0xff]  ;;  %v280_v63 = vld [vmem:[#allocation2 + $0x14] sm:$0xff] }
  0x64   : > { %v283_v0 = vadd.f32 %v279_v62, %v278_v61  ;;  %v281_v1 = vld [vmem:[#allocation2 + $0x1c] sm:$0xff]  ;;  %v284_v2 = vadd.f32 %v280_v63, %v279_v62 }
  0x65   : > { %v282_v3 = vld [vmem:[#allocation2 + $0x24] sm:$0xff]  ;;  %v285_v4 = vadd.f32 %v281_v1, %v280_v63 }
  0x66   : > { %v288_v5 = vadd.f32 %v283_v0, %v280_v63  ;;  %v289_v6 = vadd.f32 %v284_v2, %v281_v1  ;;  %v286_v7 = vadd.f32 %v282_v3, %v281_v1  ;;  %v287_v9 = vld [vmem:[#allocation2 + $0x2c] sm:$0xff] }
  0x67   : > { %v290_v8 = vadd.f32 %v285_v4, %v282_v3 }
  0x68   : > { %v296_v10 = vadd.f32 %v288_v5, %v745_v14  ;;  %v297_v11 = vadd.f32 %v289_v6, %v747_v21  ;;  %v291_v12 = vadd.f32 %v287_v9, %v286_v7 }
  0x69   : > { %v298_v13 = vadd.f32 %v290_v8, %v749_v22 }
  0x6a   : > { %v300_v15 = vmul.f32 0.04, %v296_v10  ;;  %v301_v16 = vmul.f32 0.04, %v297_v11  ;;  %v299_v17 = vadd.f32 %v291_v12, %v751_v25 }
  0x6b   : > { %v302_v14 = vmul.f32 0.04, %v298_v13 }
  0x6c   : > { %304 = vst [vmem:[%s151_s18] sm:$0xff] %v300_v15  ;;  %305 = vst [vmem:[%s151_s18 + $0x8] sm:$0xff] %v301_v16  ;;  %v303_v18 = vmul.f32 0.04, %v299_v17 }
  0x6d   : > { %306 = vst [vmem:[%s151_s18 + $0x10] sm:$0xff] %v302_v14 }
  0x6e   : > { %307 = vst [vmem:[%s151_s18 + $0x18] sm:$0xff] %v303_v18 }
  0x6f   : > { %536 = shalt.err (!%p533_p5)
}
  0x70   : > { %s537_s17 = scalar_lea.hbm %s765_s5, 512  ;;  %s541_s24 = scalar_lea.hbm %s815_s1, 1024 }
  0x71   : > { %p538_p4 = scmp.ne.s32.totalorder %s765_s5, %s537_s17  ;;  %p542_p12 = scmp.lt.u32.totalorder %s765_s5, %s815_s1 }
  0x72   : > { %p543_p1 = scmp.lt.u32.totalorder %s541_s24, %s537_s17  ;;  %p545_p8 = scmp.lt.u32.totalorder %s537_s17, %s765_s5 }
  0x73   : > { %p539_p7 = pnand %p538_p4, %p823_p9 }
  0x74   : > { %p544_p3 = por %p543_p1, %p542_p12 }
  0x75   : > { %p540_p10 = pneg %p539_p7 }
  0x76   : > { %p546_p11 = por %p545_p8, %p544_p3 }
  0x78   : > { %p547_p0 = pnand %p546_p11, %p540_p10 }
  0x7a   : > { %550 = shalt.err (!%p547_p0)
}
  0x7b   : > { %s611_s3 = smov 128   ;;  %s612_s4 = smov 8  }
  0x7c   : > { %429 = dma.vmem_to_hbm [thread:$0]  (%p823_p9), %s760_s27, 512, %s765_s5, %s309_s9, %s611_s3, %s611_s3, %s612_s4  }
  0x7d PF: > { %s338_s18 = sand.u32 1, %s585_s6   ;;  %p824_p6 = scmp.ne.s32.totalorder %s820_s21, 0 }
  0x7e   : > { %p825_p13 = scmp.ge.s32.totalorder %s605_s11, 2  ;;  %s339_s29 = scalar_lea.sflag [#allocation6], %s338_s18 }
  0x80   : > { %p436_p2 = pnand %p825_p13, %p824_p6 }
  0x82   : > { %580 = dma.done.wait (!%p436_p2), %s339_s29, 512  }
  0x83   : > { %582 = vsyncadd (!%p436_p2), %s339_s29, 4294966784  ;;  %s17_s11 = sadd.s32 1, %s605_s11   ;;  %s826_s6 = smov %s589_s7 }
  0x84   : > { %p14_p5 = scmp.ge.s32.totalorder %s17_s11, 4   ;;  %s827_s7 = smov %s593_s8 }
  0x85   : > { %s828_s8 = smov %s679_s20  ;;  %s829_s9 = smov %s601_s10 }
  0x86   : > { %s830_s10 = smov %s832_s14  ;;  %16 = sbr.rel (!%p14_p5) target bundleno = 6 (0x6), region = 69 }
  0x8d   :  { %344 = vsyncpa [#allocation5], 1 }
  0x8e   :  { %346 = vsyncpa [#allocation5 + $0x1], 1 }
  0x8f   :  { %347 = vsyncpa [#allocation6], 1 }
  0x90   :  { %349 = vsyncpa [#allocation6 + $0x1], 1 }

</bundles_post_ra>
